<compile_context>
chip_gen: v5e
topology: v5e:2x2
jax: 0.10.0
libtpu: 0.0.40
codegen_flags: <defaults>
</compile_context>

<pallas_src>
import functools
import math

import jax
import jax.numpy as jnp
from jax.experimental import pallas as pl
from jax.experimental.pallas import tpu as pltpu


def _pick_sizes():
    """(per-input target block bytes, scoped VMEM limit), generation aware."""
    try:
        vmem = int(pltpu.get_tpu_info().vmem_capacity_bytes)
    except Exception:
        vmem = None
    if vmem is not None and vmem >= 96 * 1024 * 1024:
        # v5e / v6e: 128 MiB physical VMEM -> bigger blocks, higher scoped limit.
        return 4 * 1024 * 1024, 64 * 1024 * 1024
    # v7x (64 MiB physical per TC) or unknown: stay conservative.
    return 2 * 1024 * 1024, 32 * 1024 * 1024


def _map_start_rows(rows, h, offset):
    """bool (rows, 1): True where (local_row + offset) % h == 0 (h, offset static)."""
    idx = jax.lax.broadcasted_iota(jnp.int32, (rows, 1), 0) + offset
    if h & (h - 1) == 0:  # power of two
        return (idx & (h - 1)) == 0
    # Exact for idx < 2**22: round(idx/h)*h == idx  iff  h divides idx.
    idxf = idx.astype(jnp.float32)
    k = jnp.floor(idxf * (1.0 / h) + 0.5)
    return (k * jnp.float32(h)) == idxf


def _expand_row_mask(mask_rows, shape):
    """(rows, 1) bool -> `shape` bool via an i32 lane broadcast (no i1 broadcast)."""
    return jnp.broadcast_to(mask_rows.astype(jnp.int32), shape) != 0


def _adjustment_loss_kernel(a_ref, b_ref, out_ref, *, h, rows_per_block,
                            valid_rows_total, ragged, lane_aligned):
    # Blocks keep the inputs' native dtype (bf16 halves HBM bytes); upcast here.
    a = a_ref[...].astype(jnp.float32)
    b = b_ref[...].astype(jnp.float32)
    rows, w = a.shape

    if ragged:
        # Rows at/after `limit` belong to the partial last block and may hold
        # arbitrary garbage: mask them out of every term with a select.
        limit = valid_rows_total - pl.program_id(0) * rows_per_block
        row_valid = jax.lax.broadcasted_iota(jnp.int32, (rows, 1), 0) < limit
    else:
        limit = None
        row_valid = None

    # --- mean((A_low - A_high)^2) numerator ----------------------------------
    d = a - b
    sq = d * d
    if row_valid is not None:
        sq = jnp.where(_expand_row_mask(row_valid, sq.shape), sq, 0.0)
    acc = jnp.sum(sq)

    # --- x (width) gradient term (computed & reduced before y temporaries) ----
    if w > 1:
        if lane_aligned:
            # roll(x,1,axis=1)[r,c] == x[r,c-1]; column 0 is the wrap-around pair.
            gx = (jnp.abs(a - pltpu.roll(a, shift=1, axis=1))
                  - jnp.abs(b - pltpu.roll(b, shift=1, axis=1)))
            ex = gx * gx
            col = jax.lax.broadcasted_iota(jnp.int32, ex.shape, 1)
            ex = jnp.where(col >= 1, ex, 0.0)
        else:
            # W not a multiple of 128: neighbour via static lane-offset slices.
            gx = (jnp.abs(a[:, 1:] - a[:, :-1])
                  - jnp.abs(b[:, 1:] - b[:, :-1]))
            ex = gx * gx
        if row_valid is not None:
            ex = jnp.where(_expand_row_mask(row_valid, ex.shape), ex, 0.0)
        acc = acc + jnp.sum(ex)

    # --- y (height) gradient term ---------------------------------------------
    if h > 1:
        if lane_aligned:
            gy = (jnp.abs(a - pltpu.roll(a, shift=1, axis=0))
                  - jnp.abs(b - pltpu.roll(b, shift=1, axis=0)))
            ey = gy * gy
            ok = jnp.logical_not(_map_start_rows(rows, h, 0))  # not first row of a map
            if row_valid is not None:
                ok = jnp.logical_and(ok, row_valid)
            ey = jnp.where(_expand_row_mask(ok, ey.shape), ey, 0.0)
        else:
            gy = (jnp.abs(a[1:, :] - a[:-1, :])
                  - jnp.abs(b[1:, :] - b[:-1, :]))
            ey = gy * gy
            # Pair (j, j+1) valid iff j+1 is not a map start (and both rows real).
            ok = jnp.logical_not(_map_start_rows(rows - 1, h, 1))
            if limit is not None:
                jr = jax.lax.broadcasted_iota(jnp.int32, (rows - 1, 1), 0)
                ok = jnp.logical_and(ok, jr < (limit - 1))
            ey = jnp.where(_expand_row_mask(ok, ey.shape), ey, 0.0)
        acc = acc + jnp.sum(ey)

    # One scalar partial per step, lane-broadcast so the store is an unmasked vst.
    out_ref[...] = jnp.full((1, 1, 128), acc, dtype=jnp.float32)


def adjustment_loss(a_low, a_high, *, target_block_bytes=None, vmem_limit_bytes=None):
    """loss_grad + loss_square of AdjustmentLoss.forward (scalar float32)."""
    assert a_low.shape == a_high.shape and a_low.ndim == 4, (a_low.shape, a_high.shape)
    n, c, h, w = a_low.shape
    nc = n * c

    if target_block_bytes is None or vmem_limit_bytes is None:
        tbb, vlb = _pick_sizes()
        target_block_bytes = tbb if target_block_bytes is None else target_block_bytes
        vmem_limit_bytes = vlb if vmem_limit_bytes is None else vmem_limit_bytes

    item_lo = jnp.dtype(a_low.dtype).itemsize
    item_hi = jnp.dtype(a_high.dtype).itemsize
    itemsize = max(item_lo, item_hi)          # for DMA-byte sizing
    sub = max(8, 32 // min(item_lo, item_hi))  # packed sublane tile (8/16/32)

    # Per-map vreg footprint (lanes round up to 128 even though we never pad HBM).
    w_lanes = ((w + 127) // 128) * 128
    map_lane_elems = h * w_lanes

    # Dtype-aware DMA-sized blocks, capped by a VMEM working-set estimate:
    # 2 inputs x double buffer in native dtype + ~6 live f32 block temporaries.
    per_map_vmem = map_lane_elems * (4 * itemsize + 6 * 4)
    tb_vmem = max(1, (vmem_limit_bytes * 3 // 4) // per_map_vmem)
    tb_dma = max(1, target_block_bytes // (map_lane_elems * itemsize))
    tb = max(1, min(nc, tb_dma, tb_vmem))

    # Megacore: keep >= 2 grid steps when there is more than one map so v7x can
    # shard the "parallel" grid axis across both TensorCores.
    if nc > 1:
        tb = min(tb, (nc + 1) // 2)

    # Align the block's sublane extent (tb*h) to the packed tile of the dtype.
    step = sub // math.gcd(sub, h)
    tb = max(step, (tb // step) * step)

    g = pl.cdiv(nc, tb)
    rows_per_block = tb * h
    ragged = (nc % tb) != 0          # partial last block -> in-kernel row mask
    lane_aligned = (w % 128) == 0    # roll path vs. slice path

    # Free reshape: every map is a contiguous block of H rows; no HBM pad pass.
    a2 = a_low.reshape(nc * h, w)
    b2 = a_high.reshape(nc * h, w)

    kernel = functools.partial(
        _adjustment_loss_kernel, h=h, rows_per_block=rows_per_block,
        valid_rows_total=nc * h, ragged=ragged, lane_aligned=lane_aligned)

    partials = pl.pallas_call(
        kernel,
        out_shape=jax.ShapeDtypeStruct((g, 1, 128), jnp.float32),
        grid_spec=pltpu.PrefetchScalarGridSpec(
            num_scalar_prefetch=0,
            grid=(g,),
            in_specs=[
                pl.BlockSpec((rows_per_block, w), lambda i: (i, 0)),
                pl.BlockSpec((rows_per_block, w), lambda i: (i, 0)),
            ],
            out_specs=pl.BlockSpec((1, 1, 128), lambda i: (i, 0, 0)),
        ),
        compiler_params=pltpu.CompilerParams(
            # Independent per-step partials -> no resident accumulator, so the
            # grid can shard across both TensorCores on v7x.
            dimension_semantics=("parallel",),
            vmem_limit_bytes=vmem_limit_bytes,
        ),
    )(a2, b2)

    n_elem = jnp.float32(n * c * h * w)
    return jnp.sum(partials[:, 0, 0]) / n_elem


def _reference_loss(a_low, a_high):
    """Pure-JAX reference with the same gradient convention."""
    a = a_low.astype(jnp.float32)
    b = a_high.astype(jnp.float32)

    def grad(t, axis):
        if axis == 'x':
            d = jnp.abs(t[..., :, 1:] - t[..., :, :-1])
            return jnp.pad(d, ((0, 0), (0, 0), (0, 0), (0, 1)))
        d = jnp.abs(t[..., 1:, :] - t[..., :-1, :])
        return jnp.pad(d, ((0, 0), (0, 0), (0, 1), (0, 0)))

    x_loss = jnp.square(grad(a, 'x') - grad(b, 'x'))
    y_loss = jnp.square(grad(a, 'y') - grad(b, 'y'))
    loss_grad = jnp.mean(x_loss + y_loss)
    loss_square = jnp.mean(jnp.square(a - b))
    return loss_grad + loss_square


if __name__ == "__main__":
    def _check(shape, dtype, key):
        k1, k2 = jax.random.split(key)
        a = jax.random.uniform(k1, shape, dtype=jnp.float32).astype(dtype)
        b = jax.random.uniform(k2, shape, dtype=jnp.float32).astype(dtype)
        got = jax.block_until_ready(jax.jit(adjustment_loss)(a, b))
        want = jax.block_until_ready(_reference_loss(a, b))
        assert jnp.allclose(got, want, rtol=1e-4, atol=1e-5), (shape, dtype, got, want)

    key = jax.random.PRNGKey(0)
    keys = jax.random.split(key, 4)
    _check((2, 4, 16, 16), jnp.float32, keys[0])    # base case (W not lane-aligned)
    _check((1, 5, 20, 24), jnp.float32, keys[1])    # ragged last block, non-pow2 H
    _check((2, 4, 16, 16), jnp.bfloat16, keys[2])   # packed-sublane (16) input dtype
    _check((1, 2, 8, 128), jnp.float32, keys[3])    # lane-aligned W -> roll path

    print("KERNEL_OK")
</pallas_src>

<mosaic_0001>
module attributes {stable_mosaic.version = 11 : i64} {
  func.func @_adjustment_loss_kernel(%arg0: i32, %arg1: memref<64x16xf32, #tpu.memory_space<vmem>>, %arg2: memref<64x16xf32, #tpu.memory_space<vmem>>, %arg3: memref<1x1x128xf32, #tpu.memory_space<vmem>>) attributes {dimension_semantics = [#tpu.dimension_semantics<parallel>], iteration_bounds = array<i64: 2>, scalar_prefetch = 0 : i64, scratch_operands = 0 : i64, tpu.core_type = #tpu.core_type<tc>, window_params = [{transform_indices = @transform_0, window_bounds = array<i64: 64, 16>}, {transform_indices = @transform_1, window_bounds = array<i64: 64, 16>}, {transform_indices = @transform_2, window_bounds = array<i64: 1, 1, 128>}]} {
    %c0 = arith.constant 0 : index
    %c0_0 = arith.constant 0 : index
    %0 = vector.load %arg1[%c0, %c0_0] : memref<64x16xf32, #tpu.memory_space<vmem>>, vector<64x16xf32>
    %c0_1 = arith.constant 0 : index
    %c0_2 = arith.constant 0 : index
    %1 = vector.load %arg2[%c0_1, %c0_2] : memref<64x16xf32, #tpu.memory_space<vmem>>, vector<64x16xf32>
    %2 = arith.subf %0, %1 : vector<64x16xf32>
    %3 = arith.mulf %2, %2 : vector<64x16xf32>
    %4 = vector.shape_cast %3 : vector<64x16xf32> to vector<1x64x16xf32>
    %cst = arith.constant dense<0.000000e+00> : vector<1xf32>
    %5 = vector.multi_reduction <add>, %4, %cst [1, 2] : vector<1x64x16xf32> to vector<1xf32>
    %6 = vector.shape_cast %5 : vector<1xf32> to vector<1x1x1xf32>
    %7 = vector.extract %6[0, 0, 0] : f32 from vector<1x1x1xf32>
    %8 = vector.extract_strided_slice %0 {offsets = [0, 1], sizes = [64, 15], strides = [1, 1]} : vector<64x16xf32> to vector<64x15xf32>
    %9 = vector.extract_strided_slice %0 {offsets = [0, 0], sizes = [64, 15], strides = [1, 1]} : vector<64x16xf32> to vector<64x15xf32>
    %10 = arith.subf %8, %9 : vector<64x15xf32>
    %11 = math.absf %10 : vector<64x15xf32>
    %12 = vector.extract_strided_slice %1 {offsets = [0, 1], sizes = [64, 15], strides = [1, 1]} : vector<64x16xf32> to vector<64x15xf32>
    %13 = vector.extract_strided_slice %1 {offsets = [0, 0], sizes = [64, 15], strides = [1, 1]} : vector<64x16xf32> to vector<64x15xf32>
    %14 = arith.subf %12, %13 : vector<64x15xf32>
    %15 = math.absf %14 : vector<64x15xf32>
    %16 = arith.subf %11, %15 : vector<64x15xf32>
    %17 = arith.mulf %16, %16 : vector<64x15xf32>
    %18 = vector.shape_cast %17 : vector<64x15xf32> to vector<1x64x15xf32>
    %cst_3 = arith.constant dense<0.000000e+00> : vector<1xf32>
    %19 = vector.multi_reduction <add>, %18, %cst_3 [1, 2] : vector<1x64x15xf32> to vector<1xf32>
    %20 = vector.shape_cast %19 : vector<1xf32> to vector<1x1x1xf32>
    %21 = vector.extract %20[0, 0, 0] : f32 from vector<1x1x1xf32>
    %22 = arith.addf %7, %21 : f32
    %23 = vector.extract_strided_slice %0 {offsets = [1, 0], sizes = [63, 16], strides = [1, 1]} : vector<64x16xf32> to vector<63x16xf32>
    %24 = vector.extract_strided_slice %0 {offsets = [0, 0], sizes = [63, 16], strides = [1, 1]} : vector<64x16xf32> to vector<63x16xf32>
    %25 = arith.subf %23, %24 : vector<63x16xf32>
    %26 = math.absf %25 : vector<63x16xf32>
    %27 = vector.extract_strided_slice %1 {offsets = [1, 0], sizes = [63, 16], strides = [1, 1]} : vector<64x16xf32> to vector<63x16xf32>
    %28 = vector.extract_strided_slice %1 {offsets = [0, 0], sizes = [63, 16], strides = [1, 1]} : vector<64x16xf32> to vector<63x16xf32>
    %29 = arith.subf %27, %28 : vector<63x16xf32>
    %30 = math.absf %29 : vector<63x16xf32>
    %31 = arith.subf %26, %30 : vector<63x16xf32>
    %32 = arith.mulf %31, %31 : vector<63x16xf32>
    %33 = tpu.iota {dimensions = array<i32: 0>} : vector<63x1xi32>
    %c1_i32 = arith.constant 1 : i32
    %34 = vector.broadcast %c1_i32 : i32 to vector<63x1xi32>
    %35 = arith.addi %33, %34 : vector<63x1xi32>
    %c15_i32 = arith.constant 15 : i32
    %36 = vector.broadcast %c15_i32 : i32 to vector<63x1xi32>
    %37 = arith.andi %35, %36 : vector<63x1xi32>
    %c0_i32 = arith.constant 0 : i32
    %38 = vector.broadcast %c0_i32 : i32 to vector<63x1xi32>
    %39 = arith.cmpi eq, %37, %38 : vector<63x1xi32>
    %cst_4 = arith.constant dense<true> : vector<63x1xi1>
    %40 = arith.xori %39, %cst_4 : vector<63x1xi1>
    %41 = arith.extui %40 : vector<63x1xi1> to vector<63x1xi32>
    %42 = vector.shape_cast %41 : vector<63x1xi32> to vector<63x1xi32>
    %43 = vector.broadcast %42 : vector<63x1xi32> to vector<63x16xi32>
    %c0_i32_5 = arith.constant 0 : i32
    %44 = vector.broadcast %c0_i32_5 : i32 to vector<63x16xi32>
    %45 = arith.cmpi ne, %43, %44 : vector<63x16xi32>
    %cst_6 = arith.constant 0.000000e+00 : f32
    %46 = vector.broadcast %cst_6 : f32 to vector<63x16xf32>
    %47 = arith.select %45, %32, %46 : vector<63x16xi1>, vector<63x16xf32>
    %48 = vector.shape_cast %47 : vector<63x16xf32> to vector<1x63x16xf32>
    %cst_7 = arith.constant dense<0.000000e+00> : vector<1xf32>
    %49 = vector.multi_reduction <add>, %48, %cst_7 [1, 2] : vector<1x63x16xf32> to vector<1xf32>
    %50 = vector.shape_cast %49 : vector<1xf32> to vector<1x1x1xf32>
    %51 = vector.extract %50[0, 0, 0] : f32 from vector<1x1x1xf32>
    %52 = arith.addf %22, %51 : f32
    %53 = vector.broadcast %52 : f32 to vector<1x1x128xf32>
    %c0_8 = arith.constant 0 : index
    %c0_9 = arith.constant 0 : index
    %c0_10 = arith.constant 0 : index
    %54 = vector.load %arg3[%c0_8, %c0_9, %c0_10] : memref<1x1x128xf32, #tpu.memory_space<vmem>>, vector<1x1x128xf32>
    tpu.vector_store %arg3[%c0_8, %c0_9, %c0_10], %53 {strides = array<i32>} : memref<1x1x128xf32, #tpu.memory_space<vmem>>, vector<1x1x128xf32>,
    return
  }
  func.func @transform_0(%arg0: i32) -> (i32, i32) {
    %c0_i32 = arith.constant 0 : i32
    %c0_i32_0 = arith.constant 0 : i32
    return %arg0, %c0_i32 : i32, i32
  }
  func.func @transform_1(%arg0: i32) -> (i32, i32) {
    %c0_i32 = arith.constant 0 : i32
    %c0_i32_0 = arith.constant 0 : i32
    return %arg0, %c0_i32 : i32, i32
  }
  func.func @transform_2(%arg0: i32) -> (i32, i32, i32) {
    %c0_i32 = arith.constant 0 : i32
    %c0_i32_0 = arith.constant 0 : i32
    %c0_i32_1 = arith.constant 0 : i32
    return %arg0, %c0_i32, %c0_i32_0 : i32, i32, i32
  }
}

</mosaic_0001>

<bundles_post_ra>
// kernel: adjustment_loss.1
= control target key start
LH: loop header
LB: loop body
LE: loop exit
PB: predicated region body
PF: predicated region fallthrough
CT: control target
= control target key end

     0   :  { %7 = vsyncpa [#allocation3], 0  ;;  %s1289_s0 = inlined_call_operand.hbm [shape: f32[128,16], index: 0, kind: input, shape index: {}]   ;;  %s1290_s1 = inlined_call_operand.hbm [shape: f32[128,16], index: 1, kind: input, shape index: {}]   ;;  %s1291_s2 = inlined_call_operand.vmem [shape: f32[2,1,128], index: 2, kind: output, shape index: {}]  }
   0x1   :  { %9 = vsyncpa [#allocation3 + $0x1], 0 }
   0x2   :  { %10 = vsyncpa [#allocation5], 0 }
   0x3   :  { %12 = vsyncpa [#allocation5 + $0x1], 0  ;;  %s910_s9 = smov 0   ;;  %s912_s10 = smov 0  }
   0x4   :  { %s914_s11 = smov 0   ;;  %s916_s12 = smov 0  }
   0x5 LB: > { %s929_s13 = sadd.s32 4294967295, %s888_s12   ;;  %s932_s14 = sadd.s32 1, %s888_s12   ;;  %s888_s12 = sphi %s916_s12, %s1305_s12   ;;  %s884_s11 = sphi %s914_s11, %s1304_s11   ;;  %s880_s10 = sphi %s912_s10, %s1303_s10   ;;  %s876_s9 = sphi %s910_s9, %s1302_s9  }
   0x6   : > { %s22_s15 = ssub.s32 %s888_s12, %s932_s14  ;;  %s25_s16 = sadd.s32 1, %s884_s11 }
   0x7   : > { %p23_p0 = scmp.eq.s32.totalorder %s22_s15, 0  ;;  %p32_p1 = scmp.ne.s32.totalorder %s884_s11, %s880_s10 }
   0x8   : > { %p33_p2 = scmp.eq.s32.totalorder %s888_s12, 0  ;;  %p38_p3 = scmp.ne.s32.totalorder %s880_s10, %s876_s9 }
   0x9   : > { %s942_s17 = scalar_select %p23_p0, %s884_s11, %s25_s16  }
   0xa   : > { %p944_p4 = por %p33_p2, %p32_p1  ;;  %p39_p5 = scmp.eq.s32.totalorder %s929_s13, 0 }
   0xb   : > { %p752_p6 = scmp.lt.s32.totalorder %s888_s12, 2  ;;  %s955_s20 = sand.u32 1, %s884_s11  }
   0xc   : > { %p950_p7 = por %p39_p5, %p38_p3  ;;  %s722_s21 = sshll.u32 %s955_s20, 6 }
   0xd   : > { %s733_s22 = sshll.u32 %s888_s12, 6  ;;  %s118_s26 = scalar_lea.vmem [#allocation2], %s722_s21 }
   0xe   : > { %s123_s25 = scalar_lea.hbm %s1289_s0, %s733_s22  ;;  %s126_s27 = sshll.u32 %s118_s26, 4  ;;  %s127_s27 = int_to_ptr.vmem [resolvable:$true] %s126_s27 }
   0xf   : > { %s124_s28 = sshll.u32 %s123_s25, 4  ;;  %p968_p8 = pnand %p752_p6, %p944_p4  ;;  %s125_s28 = int_to_ptr.hbm [resolvable:$true] %s124_s28 }
  0x10   : > { %p728_p9 = scmp.ge.s32.totalorder %s888_s12, 1  ;;  %s115_s30 = scalar_lea.sflag [#allocation3], %s955_s20 }
  0x11   : > { %s790_s3 = sshra.s32 %s125_s28, 4  ;;  %p794_p11 = pneg %p968_p8  ;;  %s791_s3 = int_to_ptr.hbm [resolvable:$true] %s790_s3 }
  0x12   : > { %s792_s4 = scalar_lea.hbm %s791_s3, 64  ;;  %s797_s7 = scalar_lea.hbm %s1289_s0, 128 }
  0x13   : > { %p793_p10 = scmp.ne.s32.totalorder %s791_s3, %s792_s4  ;;  %p798_p0 = scmp.lt.s32.totalorder %s791_s3, %s1289_s0 }
  0x14   : > { %p799_p1 = scmp.lt.s32.totalorder %s797_s7, %s792_s4 }
  0x15   : > { %p795_p12 = pnand %p794_p11, %p793_p10 }
  0x16   : > { %p800_p2 = por %p799_p1, %p798_p0 }
  0x17   : > { %p796_p13 = pneg %p795_p12 }
  0x19   : > { %p801_p3 = pnand %p800_p2, %p796_p13 }
  0x1b   : > { %804 = shalt.err (!%p801_p3)
}
  0x1c   : > { %s890_s15 = smov 128   ;;  %s891_s16 = smov 8  }
  0x1d   : > { %748 = dma.hbm_to_vmem [thread:$0]  (!%p968_p8), %s125_s28, 1024, %s127_s27, %s115_s30, %s890_s15, %s890_s15, %s891_s16  }
  0x1e   : > { %p156_p4 = scmp.lt.s32.totalorder %s888_s12, 3  ;;  %s145_s24 = scalar_lea.hbm %s1290_s1, %s733_s22 }
  0x1f   : > { %s146_s26 = sshll.u32 %s145_s24, 4  ;;  %s140_s3 = scalar_lea.vmem [#allocation4], %s722_s21  ;;  %s147_s26 = int_to_ptr.hbm [resolvable:$true] %s146_s26 }
  0x20   : > { %p995_p5 = pnand %p728_p9, %p156_p4  ;;  %s148_s4 = sshll.u32 %s140_s3, 4  ;;  %s149_s4 = int_to_ptr.vmem [resolvable:$true] %s148_s4 }
  0x21   : > { %s137_s5 = scalar_lea.sflag [#allocation5], %s955_s20  ;;  %s820_s6 = sshra.s32 %s147_s26, 4  ;;  %s821_s6 = int_to_ptr.hbm [resolvable:$true] %s820_s6 }
  0x22   : > { %s822_s27 = scalar_lea.hbm %s821_s6, 64  ;;  %s827_s28 = scalar_lea.hbm %s1290_s1, 128 }
  0x23   : > { %p823_p6 = scmp.ne.s32.totalorder %s821_s6, %s822_s27  ;;  %p828_p9 = scmp.lt.s32.totalorder %s821_s6, %s1290_s1 }
  0x24   : > { %p829_p13 = scmp.lt.s32.totalorder %s827_s28, %s822_s27 }
  0x25   : > { %p825_p10 = pnand %p823_p6, %p794_p11 }
  0x26   : > { %p830_p0 = por %p829_p13, %p828_p9 }
  0x27   : > { %p826_p12 = pneg %p825_p10 }
  0x29   : > { %p831_p1 = pnand %p830_p0, %p826_p12 }
  0x2b   : > { %834 = shalt.err (!%p831_p1)
}
  0x2c   : > { %751 = dma.hbm_to_vmem [thread:$0]  (!%p968_p8), %s147_s26, 1024, %s149_s4, %s137_s5, %s890_s15, %s890_s15, %s891_s16  }
  0x2d   : > { %160 = sbr.rel (%p995_p5) target bundleno = 514 (0x202), region = 28  ;;  %s162_s20 = sand.u32 (!%p995_p5), 1, %s880_s10  }
  0x2e   : > { %s729_s21 = sshll.u32 (!%p995_p5), %s162_s20, 6  ;;  %s163_s8 = scalar_lea.sflag (!%p995_p5), [#allocation3], %s162_s20 }
  0x2f   : > { %s1016_s9 = scalar_lea.vmem (!%p995_p5), [#allocation2], %s729_s21 }
  0x32   : > { %867 = dma.done.wait (%p950_p7), %s163_s8, 1024  }
  0x33   : > { %869 = vsyncadd (%p950_p7), %s163_s8, 4294966272  ;;  %s173_s18 = scalar_lea.sflag [#allocation5], %s162_s20  ;;  %s1022_s23 = scalar_lea.vmem [#allocation4], %s729_s21 }
  0x34   : > { %871 = dma.done.wait (%p950_p7), %s173_s18, 1024  }
  0x35   : > { %873 = vsyncadd (%p950_p7), %s173_s18, 4294966272  ;;  %v1029_v0 = vld [vmem:[%s1022_s23] sm:$0xff]  ;;  %s892_s29 = smov 1   ;;  %v1039_v2 = vld [vmem:[%s1016_s9 + $0x10] sm:$0xff]  ;;  %s893_s19 = smov 127   ;;  %vm433_vm0 = vcmask 1040384  }
  0x36   : > { %v1032_v1 = vld [vmem:[%s1016_s9] sm:$0xff]  ;;  %319 = vrot.lane.b32.xlu1 %v1029_v0, %s892_s29  ;;  %275 = vrot.lane.b32.xlu2 %v1039_v2, %s892_s29  ;;  %v1044_v3 = vld [vmem:[%s1022_s23 + $0x8] sm:$0xff]  ;;  %vm238_vm1 = vcmask 130048   ;;  %vm894_vm4 = vmmov 1   ;;  %vm577_vm6 = vcmask 1046528   ;;  %vm622_vm12 = vcmask 129024  }
  0x37   : > { %271 = vrot.lane.b32.xlu0 %v1032_v1, %s892_s29  ;;  %v1047_v4 = vld [vmem:[%s1016_s9 + $0x8] sm:$0xff]  ;;  %v1050_v5 = vld [vmem:[%s1022_s23 + $0x10] sm:$0xff]  ;;  %v1059_v6 = vld [vmem:[%s1022_s23 + $0x18] sm:$0xff]  ;;  %vm407_vm13 = vcmask 121856   ;;  %p203_p7 = scmp.lt.s32.totalorder %s929_s13, 1 }
  0x38   : > { %v1062_v7 = vld [vmem:[%s1016_s9 + $0x18] sm:$0xff]  ;;  %v1065_v8 = vld [vmem:[%s1016_s9 + $0x20] sm:$0xff]  ;;  %v1074_v9 = vld [vmem:[%s1016_s9 + $0x28] sm:$0xff] }
  0x39   : > { %v1077_v10 = vld [vmem:[%s1022_s23 + $0x20] sm:$0xff]  ;;  %v1080_v11 = vld [vmem:[%s1022_s23 + $0x28] sm:$0xff]  ;;  %v1089_v12 = vld [vmem:[%s1022_s23 + $0x30] sm:$0xff]  ;;  %s1307_s13 = smov (!%p203_p7, %s929_s13), 1 }
  0x3a   : > { %v1092_v13 = vld [vmem:[%s1016_s9 + $0x30] sm:$0xff]  ;;  %v1095_v14 = vld [vmem:[%s1016_s9 + $0x38] sm:$0xff]  ;;  %s205_s4 = scalar_lea.vmem %s1291_s2, %s1307_s13 }
  0x3b   : > { %v1104_v15 = vld [vmem:[%s1022_s23 + $0x38] sm:$0xff] }
  0x3e   : > { %321 = vrot.lane.b32.xlu1 %v1044_v3, %s892_s29  ;;  %323 = vrot.lane.b32.xlu2 %v1050_v5, %s892_s29 }
  0x3f   : > { %273 = vrot.lane.b32.xlu0 %v1047_v4, %s892_s29 }
  0x46   : > { %325 = vrot.lane.b32.xlu1 %v1059_v6, %s892_s29  ;;  %279 = vrot.lane.b32.xlu2 %v1065_v8, %s892_s29 }
  0x47   : > { %277 = vrot.lane.b32.xlu0 %v1062_v7, %s892_s29 }
  0x4e   : > { %281 = vrot.lane.b32.xlu1 %v1074_v9, %s892_s29  ;;  %329 = vrot.lane.b32.xlu2 %v1080_v11, %s892_s29 }
  0x4f   : > { %327 = vrot.lane.b32.xlu0 %v1077_v10, %s892_s29 }
  0x56   : > { %331 = vrot.lane.b32.xlu1 %v1089_v12, %s892_s29  ;;  %285 = vrot.lane.b32.xlu2 %v1095_v14, %s892_s29 }
  0x57   : > { %283 = vrot.lane.b32.xlu0 %v1092_v13, %s892_s29 }
  0x5f   : > { %333 = vrot.lane.b32.xlu0 %v1104_v15, %s892_s29 }
  0x90   : > { %v276_v16 = vpop.permute.xlu2 %275 }
  0x91   : > { %v297_v17 = vsub.f32 %v1039_v2, %v276_v16 }
  0x93   : > { %v305_v19 = vand.u32 2147483647, %v297_v17 }
  0x98   : > { %v324_v18 = vpop.permute.xlu2 %323 }
  0x99   : > { %v345_v20 = vsub.f32 %v1050_v5, %v324_v18 }
  0x9b   : > { %v353_v21 = vand.u32 2147483647, %v345_v20 }
  0x9d   : > { %v361_v22 = vsub.f32 %v305_v19, %v353_v21 }
  0x9f   : > { %v369_v23 = vmul.f32 %v361_v22, %v361_v22 }
  0xa0   : > { %v280_v32 = vpop.permute.xlu2 %279 }
  0xa1   : > { %387 = vrot.lane.b32.xlu0 %v369_v23, %s893_s19  ;;  %v299_v50 = vsub.f32 %v1065_v8, %v280_v32  ;;  %v473_v32 = vrot.slane %v1029_v0, 7 }
  0xa3   : > { %v307_v57 = vand.u32 2147483647, %v299_v50 }
  0xa8   : > { %v320_v24 = vpop.permute.xlu1 %319  ;;  %v330_v45 = vpop.permute.xlu2 %329 }
  0xa9   : > { %v272_v25 = vpop.permute.xlu0 %271  ;;  %v343_v26 = vsub.f32 %v1029_v0, %v320_v24  ;;  %v348_v49 = vsub.f32 %v1080_v11, %v330_v45 }
  0xaa   : > { %v295_v27 = vsub.f32 %v1032_v1, %v272_v25 }
  0xab   : > { %v351_v28 = vand.u32 2147483647, %v343_v26  ;;  %v356_v55 = vand.u32 2147483647, %v348_v49 }
  0xac   : > { %v303_v29 = vand.u32 2147483647, %v295_v27 }
  0xae   : > { %v359_v30 = vsub.f32 %v303_v29, %v351_v28 }
  0xb0   : > { %v367_v31 = vmul.f32 %v359_v30, %v359_v30  ;;  %v322_v33 = vpop.permute.xlu1 %321  ;;  %v286_v20 = vpop.permute.xlu2 %285 }
  0xb1   : > { %v274_v34 = vpop.permute.xlu0 %273  ;;  %v344_v35 = vsub.f32 %v1044_v3, %v322_v33  ;;  %v302_v24 = vsub.f32 %v1095_v14, %v286_v20  ;;  %v434_v33 = vrot.slane %v1032_v1, 7  ;;  %v223_v20 = vsub.f32 %v1047_v4, %v1044_v3 }
  0xb2   : > { %v296_v36 = vsub.f32 %v1047_v4, %v274_v34  ;;  %383 = vrot.lane.b32.xlu1 %v367_v31, %s893_s19  ;;  %v474_v34 = vrot.slane %v1044_v3, 7 }
  0xb3   : > { %v352_v37 = vand.u32 2147483647, %v344_v35  ;;  %v310_v27 = vand.u32 2147483647, %v302_v24  ;;  %v435_v35 = vrot.slane %v1047_v4, 7 }
  0xb4   : > { %v304_v38 = vand.u32 2147483647, %v296_v36  ;;  %v437_v36 = vrot.slane %v1039_v2, 7 }
  0xb6   : > { %v360_v39 = vsub.f32 %v304_v38, %v352_v37  ;;  %v476_v37 = vrot.slane %v1050_v5, 7  ;;  %v475_v38 = vsel %vm433_vm0, %v473_v32, %v474_v34 }
  0xb8   : > { %v368_v40 = vmul.f32 %v360_v39, %v360_v39  ;;  %v326_v41 = vpop.permute.xlu1 %325  ;;  %v436_v39 = vsel %vm433_vm0, %v434_v33, %v435_v35 }
  0xb9   : > { %v278_v42 = vpop.permute.xlu0 %277  ;;  %v346_v43 = vsub.f32 %v1059_v6, %v326_v41  ;;  %v457_v41 = vsub.f32 %v1032_v1, %v434_v33  ;;  %v458_v45 = vsub.f32 %v1047_v4, %v436_v39  ;;  %v224_v4 = vsub.f32 %v1039_v2, %v1050_v5 }
  0xba   : > { %v298_v44 = vsub.f32 %v1062_v7, %v278_v42  ;;  %385 = vrot.lane.b32.xlu2 %v368_v40, %s893_s19  ;;  %v496_v40 = vsub.f32 %v1029_v0, %v473_v32  ;;  %v438_v42 = vsel %vm433_vm0, %v435_v35, %v437_v36  ;;  %v484_v32 = vrot.slane %v1089_v12, 7 }
  0xbb   : > { %v354_v46 = vand.u32 2147483647, %v346_v43  ;;  %v477_v43 = vsel %vm433_vm0, %v474_v34, %v476_v37  ;;  %v465_v50 = vand.u32 2147483647, %v457_v41 }
  0xbc   : > { %v306_v47 = vand.u32 2147483647, %v298_v44  ;;  %v497_v44 = vsub.f32 %v1044_v3, %v475_v38  ;;  %v504_v49 = vand.u32 2147483647, %v496_v40  ;;  %v225_v38 = vsub.f32 %v1062_v7, %v1059_v6 }
  0xbe   : > { %v362_v48 = vsub.f32 %v306_v47, %v354_v46  ;;  %v439_v46 = vrot.slane %v1062_v7, 7  ;;  %v459_v47 = vsub.f32 %v1039_v2, %v438_v42  ;;  %v232_v42 = vmul.f32 %v224_v4, %v224_v4 }
  0xc0   : > { %v370_v51 = vmul.f32 %v362_v48, %v362_v48  ;;  %v282_v52 = vpop.permute.xlu1 %281  ;;  %v498_v48 = vsub.f32 %v1050_v5, %v477_v43  ;;  %v447_v43 = vrot.slane %v1095_v14, 7 }
  0xc1   : > { %v328_v53 = vpop.permute.xlu0 %327  ;;  %v300_v54 = vsub.f32 %v1074_v9, %v282_v52  ;;  %v480_v52 = vrot.slane %v1077_v10, 7 }
  0xc2   : > { %v347_v56 = vsub.f32 %v1077_v10, %v328_v53  ;;  %389 = vrot.lane.b32.xlu1 %v370_v51, %s893_s19  ;;  %v478_v51 = vrot.slane %v1059_v6, 7  ;;  %v505_v53 = vand.u32 2147483647, %v497_v44 }
  0xc3   : > { %v308_v58 = vand.u32 2147483647, %v300_v54  ;;  %v466_v54 = vand.u32 2147483647, %v458_v45  ;;  %v486_v45 = vrot.slane %v1104_v15, 7 }
  0xc4   : > { %v355_v59 = vand.u32 2147483647, %v347_v56  ;;  %v443_v56 = vrot.slane %v1074_v9, 7 }
  0xc5   : > { %v364_v60 = vsub.f32 %v308_v58, %v356_v55  ;;  %v441_v55 = vrot.slane %v1065_v8, 7  ;;  %v467_v58 = vand.u32 2147483647, %v459_v47 }
  0xc6   : > { %v363_v61 = vsub.f32 %v307_v57, %v355_v59  ;;  %v440_v57 = vsel %vm433_vm0, %v437_v36, %v439_v46  ;;  %v506_v59 = vand.u32 2147483647, %v498_v48 }
  0xc7   : > { %v372_v62 = vmul.f32 %v364_v60, %v364_v60  ;;  %v445_v60 = vrot.slane %v1092_v13, 7  ;;  %v444_v35 = vsel %vm433_vm0, %v441_v55, %v443_v56 }
  0xc8   : > { %v371_v63 = vmul.f32 %v363_v61, %v363_v61  ;;  %v332_v16 = vpop.permute.xlu1 %331  ;;  %v222_v61 = vsub.f32 %v1032_v1, %v1029_v0  ;;  %v514_v24 = vsub.f32 %v467_v58, %v506_v59  ;;  %v487_v59 = vsel %vm433_vm0, %v484_v32, %v486_v45 }
  0xc9   : > { %v284_v17 = vpop.permute.xlu0 %283  ;;  %v349_v18 = vsub.f32 %v1089_v12, %v332_v16  ;;  %393 = vrot.lane.b32.xlu0 %v372_v62, %s893_s19  ;;  %v481_v62 = vsel %vm433_vm0, %v478_v51, %v480_v52  ;;  %v512_v16 = vsub.f32 %v465_v50, %v504_v49  ;;  %v446_v0 = vsel %vm433_vm0, %v443_v56, %v445_v60 }
  0xca   : > { %v301_v19 = vsub.f32 %v1092_v13, %v284_v17  ;;  %391 = vrot.lane.b32.xlu2 %v371_v63, %s893_s19  ;;  %v482_v63 = vrot.slane %v1080_v11, 7  ;;  %v513_v17 = vsub.f32 %v466_v54, %v505_v53  ;;  %v463_v33 = vsub.f32 %v1092_v13, %v446_v0 }
  0xcb   : > { %v357_v21 = vand.u32 2147483647, %v349_v18  ;;  %v479_v18 = vsel %vm433_vm0, %v476_v37, %v478_v51  ;;  %v1179_v34 = vmul.f32 %v514_v24, %v514_v24 }
  0xcc   : > { %v309_v22 = vand.u32 2147483647, %v301_v19  ;;  %v442_v19 = vsel %vm433_vm0, %v439_v46, %v441_v55  ;;  %v499_v1 = vsub.f32 %v1059_v6, %v479_v18  ;;  %v1173_v3 = vmul.f32 %v513_v17, %v513_v17 }
  0xcd   : > { %v471_v44 = vand.u32 2147483647, %v463_v33  ;;  %v462_v46 = vsub.f32 %v1074_v9, %v444_v35  ;;  %v485_v47 = vsel %vm433_vm0, %v482_v63, %v484_v32  ;;  %v581_v48 = vrot.slane %v1179_v34, 1 }
  0xce   : > { %v365_v23 = vsub.f32 %v309_v22, %v357_v21  ;;  %v460_v21 = vsub.f32 %v1062_v7, %v440_v57  ;;  %v528_v22 = vlaneseq  ;;  %v507_v40 = vand.u32 2147483647, %v499_v1 }
  0xcf   : > { %v579_v41 = vrot.slane %v1173_v3, 1  ;;  %v502_v7 = vsub.f32 %v1089_v12, %v485_v47  ;;  %v470_v51 = vand.u32 2147483647, %v462_v46  ;;  %v448_v55 = vsel %vm433_vm0, %v445_v60, %v447_v43 }
  0xd0   : > { %v373_v25 = vmul.f32 %v365_v23, %v365_v23  ;;  %v500_v23 = vsub.f32 %v1077_v10, %v481_v62  ;;  %v464_v58 = vsub.f32 %v1095_v14, %v448_v55  ;;  %v226_v62 = vsub.f32 %v1065_v8, %v1077_v10 }
  0xd1   : > { %v334_v26 = vpop.permute.xlu0 %333  ;;  %v228_v10 = vsub.f32 %v1092_v13, %v1089_v12 }
  0xd2   : > { %395 = vrot.lane.b32.xlu1 %v373_v25, %s893_s19  ;;  %v350_v28 = vsub.f32 %v1104_v15, %v334_v26  ;;  %v461_v25 = vsub.f32 %v1065_v8, %v442_v19  ;;  %v483_v26 = vsel %vm433_vm0, %v480_v52, %v482_v63  ;;  %v508_v39 = vand.u32 2147483647, %v500_v23 }
  0xd3   : > { %v501_v36 = vsub.f32 %v1080_v11, %v483_v26  ;;  %v233_v63 = vmul.f32 %v225_v38, %v225_v38  ;;  %v503_v19 = vsub.f32 %v1104_v15, %v487_v59  ;;  %v472_v1 = vand.u32 2147483647, %v464_v58 }
  0xd4   : > { %v358_v29 = vand.u32 2147483647, %v350_v28  ;;  %v230_v28 = vmul.f32 %v222_v61, %v222_v61  ;;  %v469_v2 = vand.u32 2147483647, %v461_v25  ;;  %v510_v61 = vand.u32 2147483647, %v502_v7 }
  0xd5   : > { %v509_v6 = vand.u32 2147483647, %v501_v36  ;;  %v244_v23 = vsel %vm238_vm1, %v233_v63, 0.0  ;;  %v511_v25 = vand.u32 2147483647, %v503_v19  ;;  %v236_v33 = vmul.f32 %v228_v10, %v228_v10 }
  0xd6   : > { %v366_v30 = vsub.f32 %v310_v27, %v358_v29  ;;  %v1169_v27 = vshrl.u32 %v528_v22, 7  ;;  %v1171_v29 = vmul.f32 %v512_v16, %v512_v16  ;;  %v516_v50 = vsub.f32 %v469_v2, %v508_v39 }
  0xd7   : > { %v239_v53 = vsel %vm238_vm1, %v230_v28, 0.0  ;;  %v242_v16 = vsel %vm238_vm1, %v232_v42, 0.0  ;;  %v234_v22 = vmul.f32 %v226_v62, %v226_v62  ;;  %v518_v8 = vsub.f32 %v471_v44, %v510_v61 }
  0xd8   : > { %v374_v31 = vmul.f32 %v366_v30, %v366_v30  ;;  %v231_v30 = vmul.f32 %v223_v20, %v223_v20  ;;  %v530_v37 = vadd.s32 8, %v1169_v27  ;;  %v578_v5 = vrot.slane %v1171_v29, 1 }
  0xd9   : > { %v532_v56 = vadd.s32 24, %v1169_v27  ;;  %v517_v20 = vsub.f32 %v470_v51, %v509_v6  ;;  %v246_v28 = vsel %vm238_vm1, %v234_v22, 0.0  ;;  %v524_v4 = vmul.f32 %v516_v50, %v516_v50 }
  0xda   : > { %397 = vrot.lane.b32.xlu2 %v374_v31, %s893_s19  ;;  %v468_v31 = vand.u32 2147483647, %v460_v21  ;;  %v538_v49 = vadd.s32 1, %v530_v37  ;;  %v240_v54 = vsel %vm238_vm1, %v231_v30, 0.0  ;;  %v227_v21 = vsub.f32 %v1074_v9, %v1080_v11 }
  0xdb   : > { %v241_v57 = vadd.f32 %v240_v54, %v239_v53  ;;  %v540_v24 = vadd.s32 1, %v532_v56  ;;  %v534_v32 = vadd.s32 40, %v1169_v27  ;;  %v536_v9 = vadd.s32 56, %v1169_v27 }
  0xdc   : > { %v515_v52 = vsub.f32 %v468_v31, %v507_v40  ;;  %v546_v17 = vand.u32 15, %v538_v49  ;;  %v235_v26 = vmul.f32 %v227_v21, %v227_v21  ;;  %v525_v31 = vmul.f32 %v517_v20, %v517_v20 }
  0xdd   : > { %v243_v18 = vadd.f32 %v242_v16, %v241_v57  ;;  %v229_v11 = vsub.f32 %v1095_v14, %v1104_v15  ;;  %v548_v36 = vand.u32 15, %v540_v24  ;;  %v519_v38 = vsub.f32 %v472_v1, %v511_v25 }
  0xde   : > { %v523_v60 = vmul.f32 %v515_v52, %v515_v52  ;;  %v248_v35 = vsel %vm238_vm1, %v235_v26, 0.0  ;;  %v526_v12 = vmul.f32 %v518_v8, %v518_v8  ;;  %v542_v13 = vadd.s32 1, %v534_v32 }
  0xdf   : > { %v245_v0 = vadd.f32 %v244_v23, %v243_v18  ;;  %v237_v39 = vmul.f32 %v229_v11, %v229_v11  ;;  %v250_v40 = vsel %vm238_vm1, %v236_v33, 0.0  ;;  %v544_v2 = vadd.s32 1, %v536_v9 }
  0xe0   : > { %vm554_vm2 = vcmp.eq.s32.totalorder %v546_v17, 0  ;;  %v550_v43 = vand.u32 15, %v542_v13  ;;  %vm556_vm3 = vcmp.eq.s32.totalorder %v548_v36, 0  ;;  %v583_v15 = vrot.slane %v523_v60, 1 }
  0xe1   : > { %v247_v30 = vadd.f32 %v246_v28, %v245_v0  ;;  %v252_v27 = vsel %vm238_vm1, %v237_v39, 0.0  ;;  %vm1218_vm5 = vmxor %vm554_vm2, %vm894_vm4  ;;  %v585_v44 = vrot.slane %v524_v4, 1  ;;  %v527_v46 = vmul.f32 %v519_v38, %v519_v38 }
  0xe2   : > { %v580_v47 = vsel %vm577_vm6, %v578_v5, %v579_v41  ;;  %v552_v6 = vand.u32 15, %v544_v2  ;;  %vm1228_vm7 = vmxor %vm556_vm3, %vm894_vm4  ;;  %v582_v49 = vsel %vm577_vm6, %v579_v41, %v581_v48  ;;  %v587_v51 = vrot.slane %v525_v31, 1 }
  0xe3   : > { %v249_v37 = vadd.f32 %v248_v35, %v247_v30  ;;  %v586_v50 = vsel %vm577_vm6, %v583_v15, %v585_v44  ;;  %vm558_vm8 = vcmp.eq.s32.totalorder %v550_v43, 0  ;;  %v584_v29 = vsel %vm577_vm6, %v581_v48, %v583_v15 }
  0xe4   : > { %v589_v5 = vrot.slane %v526_v12, 1  ;;  %v602_v52 = vsel %vm1218_vm5, %v582_v49, 0.0  ;;  %v609_v53 = vsel %vm238_vm1, %v580_v47, 0.0  ;;  %v604_v3 = vsel %vm1228_vm7, %v586_v50, 0.0  ;;  %vm1247_vm9 = vmxor %vm558_vm8, %vm894_vm4 }
  0xe5   : > { %v251_v42 = vadd.f32 %v250_v40, %v249_v37  ;;  %v610_v34 = vsel %vm238_vm1, %v602_v52, 0.0  ;;  %v612_v48 = vsel %vm238_vm1, %v584_v29, 0.0  ;;  %vm560_vm10 = vcmp.eq.s32.totalorder %v552_v6, 0 }
  0xe6   : > { %v590_v54 = vsel %vm577_vm6, %v587_v51, %v589_v5  ;;  %v588_v55 = vsel %vm577_vm6, %v585_v44, %v587_v51  ;;  %v591_v56 = vrot.slane %v527_v46, 1  ;;  %v611_v57 = vadd.f32 %v610_v34, %v609_v53  ;;  %vm568_vm11 = vmxor %vm560_vm10, %vm894_vm4 }
  0xe7   : > { %v253_v45 = vadd.f32 %v252_v27, %v251_v42  ;;  %v614_v58 = vsel %vm238_vm1, %v604_v3, 0.0  ;;  %v606_v59 = vsel %vm1247_vm9, %v590_v54, 0.0  ;;  %v616_v62 = vsel %vm238_vm1, %v588_v55, 0.0 }
  0xe8   : > { %v613_v61 = vadd.f32 %v612_v48, %v611_v57  ;;  %v592_v63 = vsel %vm577_vm6, %v589_v5, %v591_v56  ;;  %v618_v17 = vsel %vm238_vm1, %v606_v59, 0.0  ;;  %v608_v18 = vsel %vm568_vm11, %v591_v56, 0.0 }
  0xe9   : > { %v620_v20 = vsel %vm238_vm1, %v592_v63, 0.0  ;;  %v623_v22 = vsel %vm622_vm12, %v608_v18, 0.0 }
  0xea   : > { %v615_v16 = vadd.f32 %v614_v58, %v613_v61 }
  0xec   : > { %v617_v19 = vadd.f32 %v616_v62, %v615_v16 }
  0xee   : > { %v619_v21 = vadd.f32 %v618_v17, %v617_v19 }
  0xf0   : > { %v621_v24 = vadd.f32 %v620_v20, %v619_v21 }
  0xf2   : > { %v624_v0 = vadd.f32 %v623_v22, %v621_v24 }
  0xf3   : > { %254 = vadd.xlane.f32.xlu0 %v253_v45 }
 0x103   : > { %625 = vadd.xlane.f32.xlu2 %v624_v0 }
 0x113   : > { %v388_v25 = vpop.permute.xlu0 %387 }
 0x114   : > { %v386_v23 = vpop.permute.xlu2 %385  ;;  %v411_v28 = vsel %vm407_vm13, %v388_v25, 0.0 }
 0x115   : > { %v409_v8 = vsel %vm407_vm13, %v386_v23, 0.0 }
 0x124   : > { %v384_v60 = vpop.permute.xlu1 %383  ;;  %v392_v4 = vpop.permute.xlu2 %391 }
 0x125   : > { %v408_v1 = vsel %vm407_vm13, %v384_v60, 0.0  ;;  %v415_v11 = vsel %vm407_vm13, %v392_v4, 0.0 }
 0x126   : > { %v410_v10 = vadd.f32 %v409_v8, %v408_v1 }
 0x128   : > { %v412_v31 = vadd.f32 %v411_v28, %v410_v10 }
 0x134   : > { %v390_v26 = vpop.permute.xlu1 %389  ;;  %v398_v36 = vpop.permute.xlu2 %397 }
 0x135   : > { %v413_v30 = vsel %vm407_vm13, %v390_v26, 0.0  ;;  %v421_v13 = vsel %vm407_vm13, %v398_v36, 0.0 }
 0x136   : > { %v414_v32 = vadd.f32 %v413_v30, %v412_v31 }
 0x138   : > { %v416_v35 = vadd.f32 %v415_v11, %v414_v32 }
 0x13b   : > { %v394_v9 = vpop.permute.xlu0 %393 }
 0x13c   : > { %v417_v33 = vsel %vm407_vm13, %v394_v9, 0.0 }
 0x13d   : > { %v418_v37 = vadd.f32 %v417_v33, %v416_v35 }
 0x144   : > { %v396_v38 = vpop.permute.xlu1 %395 }
 0x145   : > { %v419_v12 = vsel %vm407_vm13, %v396_v38, 0.0 }
 0x146   : > { %v420_v39 = vadd.f32 %v419_v12, %v418_v37 }
 0x148   : > { %v422_v40 = vadd.f32 %v421_v13, %v420_v39 }
 0x14a   : > { %423 = vadd.xlane.f32.xlu1 %v422_v40 }
 0x166   : > { %v255_v2 = vpop.xlane.xlu0 %254 }
 0x167   : > { %v256_v42 = vrot.slane %v255_v2, 4 }
 0x169   : > { %v257_v43 = vadd.f32 %v256_v42, %v255_v2 }
 0x16b   : > { %v258_v27 = vrot.slane %v257_v43, 2 }
 0x16d   : > { %v259_v14 = vadd.f32 %v258_v27, %v257_v43 }
 0x16f   : > { %v260_v15 = vrot.slane %v259_v14, 1 }
 0x171   : > { %v261_v44 = vadd.f32 %v260_v15, %v259_v14 }
 0x173   : > { %735 = vpush %v261_v44 }
 0x176   : > { %v626_v45 = vpop.xlane.xlu2 %625 }
 0x177   : > { %v627_v46 = vrot.slane %v626_v45, 4 }
 0x179   : > { %v628_v47 = vadd.f32 %v627_v46, %v626_v45 }
 0x17b   : > { %v629_v6 = vrot.slane %v628_v47, 2 }
 0x17d   : > { %v630_v51 = vadd.f32 %v629_v6, %v628_v47 }
 0x17f   : > { %v631_v52 = vrot.slane %v630_v51, 1 }
 0x181   : > { %v632_v41 = vadd.f32 %v631_v52, %v630_v51 }
 0x1a4   : > { %s736_s15 = spop %735 }
 0x1bd   : > { %v424_v7 = vpop.xlane.xlu1 %423 }
 0x1be   : > { %v425_v49 = vrot.slane %v424_v7, 4 }
 0x1c0   : > { %v426_v50 = vadd.f32 %v425_v49, %v424_v7 }
 0x1c2   : > { %v427_v29 = vrot.slane %v426_v50, 2 }
 0x1c4   : > { %v428_v5 = vadd.f32 %v427_v29, %v426_v50 }
 0x1c6   : > { %v429_v53 = vrot.slane %v428_v5, 1 }
 0x1c8   : > { %v430_v3 = vadd.f32 %v429_v53, %v428_v5 }
 0x1ca   : > { %737 = vpush %v430_v3 }
 0x1cb   : > { %739 = vpush %v632_v41 }
 0x1fb   : > { %s738_s16 = spop %737 }
 0x1fc   : > { %s432_s24 = sadd.f32 %s738_s16, %s736_s15  ;;  %s740_s25 = spop %739 }
 0x1fe   : > { %s634_s5 = sadd.f32 %s740_s25, %s432_s24 }
 0x200   : > { %v635_v54 = vstv %s634_s5 }
 0x201   : > { %636 = vst [vmem:[%s205_s4] sm:$0x1] %v635_v54 }
 0x202 PF: > { %p15_p8 = scmp.ge.s32.totalorder %s932_s14, 4   ;;  %s1302_s9 = smov %s880_s10 }
 0x203   : > { %s1303_s10 = smov %s884_s11  ;;  %s1304_s11 = smov %s942_s17 }
 0x204   : > { %s1305_s12 = smov %s932_s14  ;;  %17 = sbr.rel (!%p15_p8) target bundleno = 5 (0x5), region = 81 }
 0x209   :  { %654 = vsyncpa [#allocation3], 1 }
 0x20a   :  { %656 = vsyncpa [#allocation3 + $0x1], 1 }
 0x20b   :  { %657 = vsyncpa [#allocation5], 1 }
 0x20c   :  { %659 = vsyncpa [#allocation5 + $0x1], 1 }

</bundles_post_ra>
